<compile_context>
chip_gen: v5e
topology: v5e:2x2
jax: 0.10.0
libtpu: 0.0.40
codegen_flags: <defaults>
</compile_context>

<pallas_src>
import math
import numpy as np
import jax
import jax.numpy as jnp
from jax import lax
from jax.experimental import pallas as pl
from jax.experimental.pallas import tpu as pltpu

S_REF = 45          # reference padded sequence length (transformer_encoding)
S_PAD = 48          # kernel-facing padded length (multiple of 8 sublanes)
RAW_FEAT = 19       # raw node-feature width fed to the transformer
LATENT_DIM = 16     # global_dim / latent_dim
EMBED_DIM = 32      # d_model (must be > 26)
N_HEADS = 4
HEAD_DIM = EMBED_DIM // N_HEADS
N_LAYERS = 2
D_FF = 2048         # nn.TransformerEncoderLayer default dim_feedforward
FF_CHUNK = 256      # FFN column chunk (keeps (48,256) live intermediate)
NCHUNK = D_FF // FF_CHUNK
LAT_EMBED = EMBED_DIM - 8 - (RAW_FEAT - 1)   # 6
OUT_DIM = 5         # output_mlp final width
OUT_PAD = 128       # lane-dense padded output width (cols 5..127 are zeros)
LN_EPS = 1e-5
NEG_INF = -1e30     # fp32-safe; score path stays fp32


# ----------------------------- Pallas plumbing ------------------------------

def _vmem_spec():
    return pl.BlockSpec(memory_space=pltpu.MemorySpace.VMEM)


def _pcall(kernel, out_shape, *args):
    return pl.pallas_call(
        kernel,
        out_shape=out_shape,
        in_specs=[_vmem_spec() for _ in args],
        out_specs=_vmem_spec(),
    )(*args)


# ------------------------------ Pallas kernels ------------------------------

def mlp3_kernel(x_ref, w1, b1, w2, b2, w3, b3, o_ref):
    # Linear -> ReLU -> Linear -> ReLU -> Linear  (NodeNumPrediction)
    x = x_ref[...]
    h = jnp.maximum(jnp.dot(x, w1[...], preferred_element_type=jnp.float32) + b1[...], 0.0)
    h = jnp.maximum(jnp.dot(h, w2[...], preferred_element_type=jnp.float32) + b2[...], 0.0)
    o_ref[...] = jnp.dot(h, w3[...], preferred_element_type=jnp.float32) + b3[...]


def make_fused_graph_init_kernel(use_final_norm):
    """One fused kernel: input embed + N encoder layers + (norm) + output MLP."""

    def kernel(src_ref, bias_ref, gvec_ref,
               win_ref, bin_ref, lwf_ref, lbf_ref,
               attA_ref, attC_ref, attB_ref, bo_ref,
               g1_ref, be1_ref, fw1_ref, fb1_ref, fw2_ref, fb2_ref,
               g2_ref, be2_ref, ng_ref, nb_ref,
               ow1_ref, ob1_ref, ow2_ref, ob2_ref, ow3_ref, ob3_ref,
               graph_ref):

        def layernorm(v, g, b):
            mu = jnp.mean(v, axis=-1, keepdims=True)
            var = jnp.mean((v - mu) ** 2, axis=-1, keepdims=True)
            return (v - mu) * lax.rsqrt(var + LN_EPS) * g + b

        key_bias = bias_ref[...]                                # (1, S_PAD) key-pad mask

        # Fused input embedding: [type_embed(8) | src[:,1:](18) | latent(6)]
        # expressed as src @ W_in + b_in + broadcast(gvec @ W_lat_full + b_lat_full)
        lat_row = (jnp.dot(gvec_ref[...], lwf_ref[...],
                           preferred_element_type=jnp.float32) + lbf_ref[...])  # (1, E)
        x = (jnp.dot(src_ref[...], win_ref[...],
                     preferred_element_type=jnp.float32) + bin_ref[...] + lat_row)  # (S_PAD, E)

        for l in range(N_LAYERS):
            # ----- multi-head self-attention with pre-folded A/B matrices -----
            # scores_h = (x @ A_h + c_h) @ x^T  ;  out_h = (P_h @ x) @ B_h
            attn = jnp.zeros((S_PAD, EMBED_DIM), jnp.float32)
            for h in range(N_HEADS):
                idx = l * N_HEADS + h
                qa = (jnp.dot(x, attA_ref[idx], preferred_element_type=jnp.float32)
                      + attC_ref[idx])                                      # (S, E)
                s = lax.dot_general(qa, x, (((1,), (1,)), ((), ())),
                                    preferred_element_type=jnp.float32)     # (S, S)
                s = s + key_bias                                            # mask padded keys
                s = s - jnp.max(s, axis=-1, keepdims=True)
                p = jnp.exp(s)
                p = p * (1.0 / jnp.sum(p, axis=-1, keepdims=True))          # exact rowsum==1
                pv = jnp.dot(p, x, preferred_element_type=jnp.float32)      # (S, E)
                attn = attn + jnp.dot(pv, attB_ref[idx],
                                      preferred_element_type=jnp.float32)   # (S, E)
            attn = attn + bo_ref[l]              # bo + sum_h bv_h @ Wo_h (folded at init)

            # residual + LayerNorm1 (post-norm, fp32)
            y = layernorm(x + attn, g1_ref[l], be1_ref[l])

            # ----- feed-forward, chunk-major weights, bf16 weights / f32 acc -----
            y_bf = y.astype(jnp.bfloat16)
            acc = jnp.zeros((S_PAD, EMBED_DIM), jnp.float32)
            for c in range(NCHUNK):
                widx = l * NCHUNK + c
                h1 = (jnp.dot(y_bf, fw1_ref[widx],
                              preferred_element_type=jnp.float32) + fb1_ref[widx])
                h1 = jnp.maximum(h1, 0.0)
                acc = acc + jnp.dot(h1.astype(jnp.bfloat16), fw2_ref[widx],
                                    preferred_element_type=jnp.float32)
            f = acc + fb2_ref[l]

            # residual + LayerNorm2
            x = layernorm(y + f, g2_ref[l], be2_ref[l])

        if use_final_norm:                  # nn.TransformerEncoder(norm=LayerNorm)
            x = layernorm(x, ng_ref[...], nb_ref[...])

        # output MLP: Linear(E,256) ReLU Linear(256,256) ReLU Linear(256,5->128pad)
        h1 = jnp.maximum(jnp.dot(x.astype(jnp.bfloat16), ow1_ref[...],
                                 preferred_element_type=jnp.float32) + ob1_ref[...], 0.0)
        h2 = jnp.maximum(jnp.dot(h1.astype(jnp.bfloat16), ow2_ref[...],
                                 preferred_element_type=jnp.float32) + ob2_ref[...], 0.0)
        graph_ref[...] = jnp.dot(h2.astype(jnp.bfloat16), ow3_ref[...],
                                 preferred_element_type=jnp.float32) + ob3_ref[...]

    return kernel


# ------------------------- deterministic parameters -------------------------

def init_params(key):
    def lin(k, fi, fo, scale=0.05, bias=0.0):
        return (scale * jax.random.normal(k, (fi, fo), jnp.float32),
                jnp.full((1, fo), bias, jnp.float32))

    keys = iter(jax.random.split(key, 64))
    p = {}
    # NodeNumPrediction: Linear(L,128) ReLU Linear(128,128) ReLU Linear(128,1)
    p["num_w1"], p["num_b1"] = lin(next(keys), LATENT_DIM, 128)
    p["num_w2"], p["num_b2"] = lin(next(keys), 128, 128)
    p["num_w3"], p["num_b3"] = lin(next(keys), 128, 1, bias=4.0)  # keep pred in [1,9]

    # TransformerGraphInit input projections, folded into one (19,32) matmul
    # plus a (16,32) latent projection landing in columns 26..31.
    type_w, type_b = lin(next(keys), 1, 8)
    lat_w, lat_b = lin(next(keys), LATENT_DIM, LAT_EMBED)
    w_in = jnp.zeros((RAW_FEAT, EMBED_DIM), jnp.float32)
    w_in = w_in.at[0, 0:8].set(type_w[0])
    w_in = w_in.at[1:RAW_FEAT, 8:8 + RAW_FEAT - 1].set(
        jnp.eye(RAW_FEAT - 1, dtype=jnp.float32))
    b_in = jnp.zeros((1, EMBED_DIM), jnp.float32).at[0, 0:8].set(type_b[0])
    lw_full = jnp.zeros((LATENT_DIM, EMBED_DIM), jnp.float32).at[:, 26:32].set(lat_w)
    lb_full = jnp.zeros((1, EMBED_DIM), jnp.float32).at[0, 26:32].set(lat_b[0])
    p["w_in"], p["b_in"], p["lw_full"], p["lb_full"] = w_in, b_in, lw_full, lb_full

    # encoder layers: fold Wq*Wk^T / Wv*Wo per head, chunk-major bf16 FFN weights
    scale = 1.0 / math.sqrt(HEAD_DIM)
    attA, attC, attB, bo_fold = [], [], [], []
    g1, be1, fw1, fb1, fw2, fb2, g2, be2 = ([] for _ in range(8))
    ones = jnp.ones((1, EMBED_DIM), jnp.float32)
    zeros = jnp.zeros((1, EMBED_DIM), jnp.float32)
    for _ in range(N_LAYERS):
        wq, bq = lin(next(keys), EMBED_DIM, EMBED_DIM)
        wk, _bk = lin(next(keys), EMBED_DIM, EMBED_DIM)  # bk adds a per-row const -> dropped
        wv, bv = lin(next(keys), EMBED_DIM, EMBED_DIM)
        wo, bo = lin(next(keys), EMBED_DIM, EMBED_DIM)
        wq_h = wq.reshape(EMBED_DIM, N_HEADS, HEAD_DIM)
        wk_h = wk.reshape(EMBED_DIM, N_HEADS, HEAD_DIM)
        wv_h = wv.reshape(EMBED_DIM, N_HEADS, HEAD_DIM)
        bq_h = bq.reshape(N_HEADS, HEAD_DIM)
        bv_h = bv.reshape(N_HEADS, HEAD_DIM)
        wo_h = wo.reshape(N_HEADS, HEAD_DIM, EMBED_DIM)
        bias_acc = bo
        for h in range(N_HEADS):
            wk_t = wk_h[:, h, :].T                                   # (d, E)
            attA.append((wq_h[:, h, :] @ wk_t) * scale)              # (E, E)  1/sqrt(d) folded
            attC.append((bq_h[h:h + 1, :] @ wk_t) * scale)           # (1, E)
            attB.append(wv_h[:, h, :] @ wo_h[h])                     # (E, E)
            bias_acc = bias_acc + bv_h[h:h + 1, :] @ wo_h[h]         # (1, E)
        bo_fold.append(bias_acc)

        g1.append(ones); be1.append(zeros)
        w1f, b1f = lin(next(keys), EMBED_DIM, D_FF)
        w2f, b2f = lin(next(keys), D_FF, EMBED_DIM)
        for c in range(NCHUNK):
            lo, hi = c * FF_CHUNK, (c + 1) * FF_CHUNK
            fw1.append(w1f[:, lo:hi].astype(jnp.bfloat16))           # (E, FF_CHUNK)
            fb1.append(b1f[:, lo:hi])                                # (1, FF_CHUNK)
            fw2.append(w2f[lo:hi, :].astype(jnp.bfloat16))           # (FF_CHUNK, E)
        fb2.append(b2f)
        g2.append(ones); be2.append(zeros)

    p["attA"] = jnp.stack(attA)   # (L*H, E, E) f32
    p["attC"] = jnp.stack(attC)   # (L*H, 1, E) f32
    p["attB"] = jnp.stack(attB)   # (L*H, E, E) f32
    p["bo"] = jnp.stack(bo_fold)  # (L, 1, E)   f32
    p["g1"] = jnp.stack(g1); p["be1"] = jnp.stack(be1)
    p["fw1"] = jnp.stack(fw1)     # (L*NCHUNK, E, FF_CHUNK) bf16
    p["fb1"] = jnp.stack(fb1)     # (L*NCHUNK, 1, FF_CHUNK) f32
    p["fw2"] = jnp.stack(fw2)     # (L*NCHUNK, FF_CHUNK, E) bf16
    p["fb2"] = jnp.stack(fb2)     # (L, 1, E)   f32
    p["g2"] = jnp.stack(g2); p["be2"] = jnp.stack(be2)

    # output_mlp (bf16 weights, fp32 biases); last layer zero-padded to 128 cols
    w, b = lin(next(keys), EMBED_DIM, 256); p["out_w1"], p["out_b1"] = w.astype(jnp.bfloat16), b
    w, b = lin(next(keys), 256, 256);       p["out_w2"], p["out_b2"] = w.astype(jnp.bfloat16), b
    w, b = lin(next(keys), 256, OUT_DIM)
    w_pad = jnp.zeros((256, OUT_PAD), jnp.float32).at[:, :OUT_DIM].set(w)
    b_pad = jnp.zeros((1, OUT_PAD), jnp.float32).at[0, :OUT_DIM].set(b[0])
    p["out_w3"], p["out_b3"] = w_pad.astype(jnp.bfloat16), b_pad

    # optional final LayerNorm (norm='layer')
    p["norm_g"] = ones
    p["norm_b"] = zeros
    return p


# --------------------- host-side graph skeleton (glue) ----------------------
# TODO(synk): torch_geometric Batch/Data assembly has no Pallas equivalent;
# graph structure is built host-side and only features flow through kernels.

def build_skeleton(n):
    intermediaries = [1.0] * n
    edge_index, feature_idx = [], []
    k = n
    for i in range(n):
        for j in range(i + 1, n):
            feature_idx.append([i, j])
            edge_index.extend([[i, k], [k, i], [k, j], [j, k]])
            intermediaries.append(-1.0)
            k += 1
        edge_index.append([i, i])
    total = int(n + (n * n - n) / 2)
    ei = np.asarray(edge_index, dtype=np.int64).T
    fi = (np.asarray(feature_idx, dtype=np.int64).T if feature_idx
          else np.zeros((2, 0), np.int64))
    return ei, np.asarray(intermediaries, np.float32), fi, total


def init_graph(n, x):
    # x: (9, 9) orthogonal random noise (numpy)
    ei, ident, fidx, total = build_skeleton(n)
    if total > 1:
        edge_features = np.concatenate([x[fidx[0]], x[fidx[1]]], axis=1)   # (P, 18)
        node_features = np.concatenate([x[:n], x[:n]], axis=1)             # (n, 18)
        feats = np.concatenate([node_features, edge_features], axis=0)     # (total, 18)
    else:
        feats = np.concatenate([x[0:1], x[0:1]], axis=1)                   # (1, 18)
    feats = np.concatenate([ident[:, None], feats], axis=1)                # (total, 19)
    return feats.astype(np.float32), ei, total


# ------------------------------ model forward -------------------------------

def num_net_forward(p, global_vec):
    out = _pcall(mlp3_kernel,
                 jax.ShapeDtypeStruct((global_vec.shape[0], 1), jnp.float32),
                 global_vec, p["num_w1"], p["num_b1"], p["num_w2"], p["num_b2"],
                 p["num_w3"], p["num_b3"])
    return out.reshape(-1)


def transformer_graph_init(p, src, global_vec, src_mask, norm):
    # src: (S_PAD, 19), global_vec: (1, LATENT_DIM), src_mask: (S_PAD,) bool
    key_bias = jnp.where(src_mask, NEG_INF, 0.0).astype(jnp.float32)[None, :]  # (1, S_PAD)
    kernel = make_fused_graph_init_kernel(norm == "layer")
    args = (src, key_bias, global_vec,
            p["w_in"], p["b_in"], p["lw_full"], p["lb_full"],
            p["attA"], p["attC"], p["attB"], p["bo"],
            p["g1"], p["be1"], p["fw1"], p["fb1"], p["fw2"], p["fb2"],
            p["g2"], p["be2"], p["norm_g"], p["norm_b"],
            p["out_w1"], p["out_b1"], p["out_w2"], p["out_b2"],
            p["out_w3"], p["out_b3"])
    graph_init = pl.pallas_call(
        kernel,
        out_shape=jax.ShapeDtypeStruct((S_PAD, OUT_PAD), jnp.float32),  # lane-dense
        in_specs=[_vmem_spec() for _ in args],
        out_specs=_vmem_spec(),
        compiler_params=pltpu.CompilerParams(vmem_limit_bytes=32 * 1024 * 1024),
    )(*args)
    return graph_init


def decoder_forward(p, global_vec, noise_seed=0, norm="layer"):
    pred_num = num_net_forward(p, global_vec)                 # (B,)
    # data=None branch of the reference module (requires B == 1): host control
    # flow; this device_get is the only host sync in the forward pass.
    n = int(round(float(jax.device_get(pred_num)[0])))
    if n < 1 or n > 9:
        return None, pred_num

    # orthogonal random positional noise: randn(9,9) -> QR, done on HOST with
    # numpy (a device QR of a 9x9 matrix + an extra transfer costs more than
    # the fused kernel itself).
    rng = np.random.default_rng(noise_seed)
    g = rng.standard_normal((9, 9)).astype(np.float32)
    q, _ = np.linalg.qr(g)
    feats, edge_index, total = init_graph(n, np.asarray(q, np.float32))

    # reference pads to 45; we pad to 48 (rows >= total are masked keys and
    # are sliced off afterwards, so the extra 3 rows are inert)
    src = np.ones((S_PAD, RAW_FEAT), np.float32)
    src[:total] = feats
    src_mask = np.zeros((S_PAD,), bool)
    src_mask[total:] = True

    graph_init = transformer_graph_init(p, jnp.asarray(src), global_vec,
                                        jnp.asarray(src_mask), norm)
    node_embeddings = graph_init[:total, :OUT_DIM]            # == graph_init[~src_mask]
    batch = {"x": node_embeddings,
             "edge_index": jnp.asarray(edge_index),
             "num_graph_nodes": total}
    return batch, pred_num


# ----------------------------------- main ------------------------------------

if __name__ == "__main__":
    key = jax.random.PRNGKey(0)
    pkey, gkey = jax.random.split(key, 2)

    params = init_params(pkey)
    global_vec = jax.random.normal(gkey, (1, LATENT_DIM), jnp.float32)

    batch, pred_num = decoder_forward(params, global_vec, noise_seed=0, norm="layer")
    jax.block_until_ready(pred_num)
    assert batch is not None, "predicted node count fell outside [1, 9]"
    jax.block_until_ready(batch["x"])
    assert batch["x"].shape[1] == 5 and batch["x"].ndim == 2
    print("KERNEL_OK")
</pallas_src>

<mosaic_0001>
module attributes {stable_mosaic.version = 11 : i64} {
  func.func @mlp3_kernel(%arg0: memref<1x16xf32, #tpu.memory_space<vmem>>, %arg1: memref<16x128xf32, #tpu.memory_space<vmem>>, %arg2: memref<1x128xf32, #tpu.memory_space<vmem>>, %arg3: memref<128x128xf32, #tpu.memory_space<vmem>>, %arg4: memref<1x128xf32, #tpu.memory_space<vmem>>, %arg5: memref<128x1xf32, #tpu.memory_space<vmem>>, %arg6: memref<1x1xf32, #tpu.memory_space<vmem>>, %arg7: memref<1x1xf32, #tpu.memory_space<vmem>>) attributes {dimension_semantics = [], scalar_prefetch = 0 : i64, scratch_operands = 0 : i64, tpu.core_type = #tpu.core_type<tc>} {
    %c0 = arith.constant 0 : index
    %c0_0 = arith.constant 0 : index
    %0 = vector.load %arg0[%c0, %c0_0] : memref<1x16xf32, #tpu.memory_space<vmem>>, vector<1x16xf32>
    %c0_1 = arith.constant 0 : index
    %c0_2 = arith.constant 0 : index
    %1 = vector.load %arg1[%c0_1, %c0_2] : memref<16x128xf32, #tpu.memory_space<vmem>>, vector<16x128xf32>
    %cst = arith.constant dense<0.000000e+00> : vector<1x128xf32>
    %2 = tpu.matmul %0, %1, %cst {dimension_numbers = #tpu.dot_dimension_numbers<[1], [0], [0], [1], [0, 0, 1, 1], [], []>} : vector<1x16xf32>, vector<16x128xf32>, vector<1x128xf32> -> vector<1x128xf32>
    %c0_3 = arith.constant 0 : index
    %c0_4 = arith.constant 0 : index
    %3 = vector.load %arg2[%c0_3, %c0_4] : memref<1x128xf32, #tpu.memory_space<vmem>>, vector<1x128xf32>
    %4 = arith.addf %2, %3 : vector<1x128xf32>
    %cst_5 = arith.constant 0.000000e+00 : f32
    %5 = vector.broadcast %cst_5 : f32 to vector<1x128xf32>
    %6 = arith.maximumf %4, %5 : vector<1x128xf32>
    %c0_6 = arith.constant 0 : index
    %c0_7 = arith.constant 0 : index
    %7 = vector.load %arg3[%c0_6, %c0_7] : memref<128x128xf32, #tpu.memory_space<vmem>>, vector<128x128xf32>
    %cst_8 = arith.constant dense<0.000000e+00> : vector<1x128xf32>
    %8 = tpu.matmul %6, %7, %cst_8 {dimension_numbers = #tpu.dot_dimension_numbers<[1], [0], [0], [1], [0, 0, 1, 1], [], []>} : vector<1x128xf32>, vector<128x128xf32>, vector<1x128xf32> -> vector<1x128xf32>
    %c0_9 = arith.constant 0 : index
    %c0_10 = arith.constant 0 : index
    %9 = vector.load %arg4[%c0_9, %c0_10] : memref<1x128xf32, #tpu.memory_space<vmem>>, vector<1x128xf32>
    %10 = arith.addf %8, %9 : vector<1x128xf32>
    %cst_11 = arith.constant 0.000000e+00 : f32
    %11 = vector.broadcast %cst_11 : f32 to vector<1x128xf32>
    %12 = arith.maximumf %10, %11 : vector<1x128xf32>
    %c0_12 = arith.constant 0 : index
    %c0_13 = arith.constant 0 : index
    %13 = vector.load %arg5[%c0_12, %c0_13] : memref<128x1xf32, #tpu.memory_space<vmem>>, vector<128x1xf32>
    %cst_14 = arith.constant dense<0.000000e+00> : vector<1x1xf32>
    %14 = tpu.matmul %12, %13, %cst_14 {dimension_numbers = #tpu.dot_dimension_numbers<[1], [0], [0], [1], [0, 0, 1, 1], [], []>} : vector<1x128xf32>, vector<128x1xf32>, vector<1x1xf32> -> vector<1x1xf32>
    %c0_15 = arith.constant 0 : index
    %c0_16 = arith.constant 0 : index
    %15 = vector.load %arg6[%c0_15, %c0_16] : memref<1x1xf32, #tpu.memory_space<vmem>>, vector<1x1xf32>
    %16 = arith.addf %14, %15 : vector<1x1xf32>
    %c0_17 = arith.constant 0 : index
    %c0_18 = arith.constant 0 : index
    %17 = vector.load %arg7[%c0_17, %c0_18] : memref<1x1xf32, #tpu.memory_space<vmem>>, vector<1x1xf32>
    tpu.vector_store %arg7[%c0_17, %c0_18], %16 {strides = array<i32>} : memref<1x1xf32, #tpu.memory_space<vmem>>, vector<1x1xf32>,
    return
  }
}

</mosaic_0001>

<bundles_post_ra>
// kernel: tpu_custom_call.1
= control target key start
LH: loop header
LB: loop body
LE: loop exit
PB: predicated region body
PF: predicated region fallthrough
CT: control target
= control target key end

     0   :  { %s383_s0 = inlined_call_operand.vmem [shape: f32[1,16], index: 0, kind: input, shape index: {}]   ;;  %s384_s1 = inlined_call_operand.hbm [shape: f32[16,128], index: 1, kind: input, shape index: {}]   ;;  %s385_s2 = inlined_call_operand.vmem [shape: f32[1,128], index: 2, kind: input, shape index: {}]   ;;  %s386_s3 = inlined_call_operand.vmem [shape: f32[128,128], index: 3, kind: input, shape index: {}]   ;;  %s387_s4 = inlined_call_operand.vmem [shape: f32[1,128], index: 4, kind: input, shape index: {}]   ;;  %s388_s5 = inlined_call_operand.vmem [shape: f32[128,1], index: 5, kind: input, shape index: {}]   ;;  %s389_s6 = inlined_call_operand.<no memory space> [shape: f32[1,1], index: 6, kind: input, shape index: {}]   ;;  %s390_s7 = inlined_call_operand.hbm [shape: f32[1,1], index: 7, kind: output, shape index: {}]  }
   0x1   :  { %v12_v0 = vstv %s389_s6 }
   0x2   :  { %13 = vst [vmem:[#allocation2] sm:$0x1] %v12_v0 }
   0x3   :  { %14 = vsyncpa [#allocation4], 0 }
   0x4   :  { %15 = vsyncpa [#allocation5], 0  ;;  %s22_s28 = sshll.u32 %s384_s1, 4  ;;  %s225_s29 = smov [#allocation3]   ;;  %s23_s28 = int_to_ptr.hbm [resolvable:$true] %s22_s28 }
   0x5   :  { %s24_s30 = sshll.u32 %s225_s29, 4  ;;  %s226_s8 = smov 128   ;;  %s25_s30 = int_to_ptr.vmem [resolvable:$true] %s24_s30 }
   0x6   :  { %s227_s9 = smov 8  }
   0x7   :  { %30 = dma.hbm_to_vmem [thread:$0]  %s23_s28, 256, %s25_s30, [#allocation4], %s226_s8, %s226_s8, %s227_s9  }
   0x8   :  { %221 = dma.done.wait [#allocation4], 256  }
   0x9   :  { %222 = vsyncadd [#allocation4], 4294967040  ;;  %v47_v1 = vld [vmem:[#allocation3 + $0x8] sm:$0xff]  ;;  %v46_v2 = vld [vmem:[#allocation3] sm:$0xff]  ;;  %vm49_vm0 = vcmask 130048   ;;  %s158_s26 = sshll.u32 %s390_s7, 4  ;;  %s159_s26 = int_to_ptr.hbm [resolvable:$true] %s158_s26 }
   0xa   :  { %67 = vmatpush.msra.mxu0 %v47_v1  ;;  %v45_v3 = vld [vmem:[%s383_s0] sm:$0x1]  ;;  %v89_v4 = vld [vmem:[%s386_s3 + $0x78] sm:$0xff]  ;;  %v88_v5 = vld [vmem:[%s386_s3 + $0x70] sm:$0xff]  ;;  %vm149_vm1 = vcmask 0  }
   0xb   :  { %91 = vmatpush.msra.mxu1 %v89_v4  ;;  %v87_v6 = vld [vmem:[%s386_s3 + $0x68] sm:$0xff]  ;;  %v86_v7 = vld [vmem:[%s386_s3 + $0x60] sm:$0xff]  ;;  %v85_v8 = vld [vmem:[%s386_s3 + $0x58] sm:$0xff] }
   0xc   :  { %68 = vmatpush.msra.mxu0 %v46_v2  ;;  %v84_v9 = vld [vmem:[%s386_s3 + $0x50] sm:$0xff]  ;;  %v83_v10 = vld [vmem:[%s386_s3 + $0x48] sm:$0xff]  ;;  %v82_v11 = vld [vmem:[%s386_s3 + $0x40] sm:$0xff] }
   0xd   :  { %168 = vmatmul.msk.f32.vlgmr.msra.gmra.mxu0 %vm49_vm0, %v45_v3  ;;  %92 = vmatpush.msra.mxu1 %v88_v5  ;;  %v81_v12 = vld [vmem:[%s386_s3 + $0x38] sm:$0xff]  ;;  %v80_v13 = vld [vmem:[%s386_s3 + $0x30] sm:$0xff]  ;;  %v79_v14 = vld [vmem:[%s386_s3 + $0x28] sm:$0xff] }
   0xe   :  { %v78_v15 = vld [vmem:[%s386_s3 + $0x20] sm:$0xff]  ;;  %v77_v16 = vld [vmem:[%s386_s3 + $0x18] sm:$0xff]  ;;  %v76_v17 = vld [vmem:[%s386_s3 + $0x10] sm:$0xff] }
   0xf   :  { %93 = vmatpush.msra.mxu1 %v87_v6  ;;  %v75_v18 = vld [vmem:[%s386_s3 + $0x8] sm:$0xff]  ;;  %v74_v19 = vld [vmem:[%s386_s3] sm:$0xff]  ;;  %v127_v20 = vld [vmem:[%s388_s5 + $0x78] sm:$0xff]  ;;  %s228_s3 = smov [#allocation6]  }
  0x10   :  { %v126_v21 = vld [vmem:[%s388_s5 + $0x70] sm:$0xff]  ;;  %129 = vmatpush.msra.mxu2 %v127_v20  ;;  %v125_v22 = vld [vmem:[%s388_s5 + $0x68] sm:$0xff]  ;;  %v124_v23 = vld [vmem:[%s388_s5 + $0x60] sm:$0xff]  ;;  %s156_s23 = sshll.u32 %s228_s3, 4  ;;  %s157_s23 = int_to_ptr.vmem [resolvable:$true] %s156_s23 }
  0x11   :  { %94 = vmatpush.msra.mxu1 %v86_v7  ;;  %v123_v24 = vld [vmem:[%s388_s5 + $0x58] sm:$0xff]  ;;  %v122_v25 = vld [vmem:[%s388_s5 + $0x50] sm:$0xff]  ;;  %v121_v26 = vld [vmem:[%s388_s5 + $0x48] sm:$0xff] }
  0x12   :  { %130 = vmatpush.msra.mxu2 %v126_v21  ;;  %v120_v27 = vld [vmem:[%s388_s5 + $0x40] sm:$0xff]  ;;  %v119_v28 = vld [vmem:[%s388_s5 + $0x38] sm:$0xff]  ;;  %v118_v29 = vld [vmem:[%s388_s5 + $0x30] sm:$0xff] }
  0x13   :  { %95 = vmatpush.msra.mxu1 %v85_v8  ;;  %v117_v30 = vld [vmem:[%s388_s5 + $0x28] sm:$0xff]  ;;  %v116_v31 = vld [vmem:[%s388_s5 + $0x20] sm:$0xff]  ;;  %v115_v32 = vld [vmem:[%s388_s5 + $0x18] sm:$0xff] }
  0x14   :  { %131 = vmatpush.msra.mxu2 %v125_v22  ;;  %v48_v33 = vld [vmem:[%s385_s2] sm:$0x1]  ;;  %v114_v37 = vld [vmem:[%s388_s5 + $0x10] sm:$0xff]  ;;  %v113_v38 = vld [vmem:[%s388_s5 + $0x8] sm:$0xff] }
  0x15   :  { %96 = vmatpush.msra.mxu1 %v84_v9  ;;  %v112_v39 = vld [vmem:[%s388_s5] sm:$0xff] }
  0x16   :  { %132 = vmatpush.msra.mxu2 %v124_v23  ;;  %v90_v40 = vld [vmem:[%s387_s4] sm:$0x1] }
  0x17   :  { %97 = vmatpush.msra.mxu1 %v83_v10  ;;  %v128_v44 = vld [vmem:[#allocation2] sm:$0x1] }
  0x18   :  { %133 = vmatpush.msra.mxu2 %v123_v24 }
  0x19   :  { %98 = vmatpush.msra.mxu1 %v82_v11 }
  0x1a   :  { %134 = vmatpush.msra.mxu2 %v122_v25 }
  0x1b   :  { %99 = vmatpush.msra.mxu1 %v81_v12 }
  0x1c   :  { %135 = vmatpush.msra.mxu2 %v121_v26 }
  0x1d   :  { %100 = vmatpush.msra.mxu1 %v80_v13 }
  0x1e   :  { %136 = vmatpush.msra.mxu2 %v120_v27 }
  0x1f   :  { %101 = vmatpush.msra.mxu1 %v79_v14 }
  0x20   :  { %137 = vmatpush.msra.mxu2 %v119_v28 }
  0x21   :  { %102 = vmatpush.msra.mxu1 %v78_v15 }
  0x22   :  { %138 = vmatpush.msra.mxu2 %v118_v29 }
  0x23   :  { %103 = vmatpush.msra.mxu1 %v77_v16 }
  0x24   :  { %139 = vmatpush.msra.mxu2 %v117_v30 }
  0x25   :  { %104 = vmatpush.msra.mxu1 %v76_v17 }
  0x26   :  { %140 = vmatpush.msra.mxu2 %v116_v31 }
  0x27   :  { %105 = vmatpush.msra.mxu1 %v75_v18 }
  0x28   :  { %141 = vmatpush.msra.mxu2 %v115_v32 }
  0x29   :  { %106 = vmatpush.msra.mxu1 %v74_v19 }
  0x2a   :  { %142 = vmatpush.msra.mxu2 %v114_v37 }
  0x2c   :  { %143 = vmatpush.msra.mxu2 %v113_v38 }
  0x2e   :  { %144 = vmatpush.msra.mxu2 %v112_v39 }
  0x8a   :  { %v70_v34 = vpop.f32.mrf.mxu0 }
  0x8b   :  { %v71_v35 = vadd.f32 %v70_v34, %v48_v33 }
  0x8d   :  { %v73_v36 = vmax.f32 %v71_v35, 0.0 }
  0x8f   :  { %107 = vmatmul.f32.vlgmr.msra.gmra.mxu1 %v73_v36 }
 0x10c   :  { %v108_v41 = vpop.f32.mrf.mxu1 }
 0x10d   :  { %v109_v42 = vadd.f32 %v108_v41, %v90_v40 }
 0x10f   :  { %v111_v43 = vmax.f32 %v109_v42, 0.0 }
 0x111   :  { %145 = vmatmul.f32.vlgmr.msra.gmra.mxu2 %v111_v43 }
 0x194   :  { %v146_v45 = vpop.f32.mrf.mxu2 }
 0x195   :  { %v147_v46 = vadd.f32 %v146_v45, %v128_v44 }
 0x197   :  { %150 = vst.msk [vmem:[#allocation6] sm:$0x1] %vm149_vm1, %v147_v46 }
 0x198   :  { %161 = dma.vmem_to_hbm [thread:$0]  %s157_s23, 16, %s159_s26, [#allocation5]  }
 0x199   :  { %223 = dma.done.wait [#allocation5], 16  }
 0x19a   :  { %224 = vsyncadd [#allocation5], 4294967280 }
 0x19b   :  { %166 = vsyncpa [#allocation4], 1 }
 0x19c   :  { %167 = vsyncpa [#allocation5], 1 }

</bundles_post_ra>
